<compile_context>
chip_gen: v7x
topology: tpu7x:2x2x1
jax: 0.10.0
libtpu: 0.0.40
codegen_flags: <defaults>
</compile_context>

<pallas_src>
import jax
import jax.numpy as jnp
from jax import lax
from jax.experimental import pallas as pl
from jax.experimental.pallas import tpu as pltpu

_MAX_BATCH_TILE = 512  # rows; ~64 KiB of f32 input per tile, far under scoped VMEM


def _dqn_kernel(x_ref, w1_ref, b1_ref, w2_ref, b2_ref, w3_ref, b3t_ref, out_ref):
    # One batch tile per grid step; all weights stay VMEM-resident.
    x = x_ref[...]                                                   # [tb, D]

    # fc1 + ReLU
    h1 = jnp.dot(x, w1_ref[...], preferred_element_type=jnp.float32)
    h1 = jnp.maximum(h1 + b1_ref[...], 0.0)                          # [tb, fc1]

    # fc2 + ReLU
    h2 = jnp.dot(h1, w2_ref[...], preferred_element_type=jnp.float32)
    h2 = jnp.maximum(h2 + b2_ref[...], 0.0)                          # [tb, fc2]

    # fc3, computed transposed: out[n, b] = sum_k w3[n, k] * h2[b, k]
    # (w3 is stored in PyTorch [n_out, fc2] layout; rhs-transposed dot -> MXU).
    actions_t = lax.dot_general(
        w3_ref[...], h2, (((1,), (1,)), ((), ())),
        preferred_element_type=jnp.float32)                          # [n_out, tb]
    out_ref[...] = (actions_t + b3t_ref[...]).astype(out_ref.dtype)


@jax.jit
def dqn_forward(state, w1, b1, w2, b2, w3, b3t):
    """state: [B, input_dim] f32.
    w1/w2 are [in, out]; w3 is [n_outputs, fc2] (PyTorch layout); b3t is [n_outputs, 1].
    Returns actions: [B, n_outputs] f32, same math as the PyTorch forward."""
    B, D = state.shape
    n_out = w3.shape[0]

    # Batch tile: sublane-aligned, as fat as reasonable. Multi-step grid only for
    # big batches (that is also what shards across both TCs on v7x).
    bp = ((B + 7) // 8) * 8
    if bp <= _MAX_BATCH_TILE:
        tb = bp
    else:
        tb = _MAX_BATCH_TILE
        bp = ((bp + tb - 1) // tb) * tb
    if bp != B:
        state = jnp.pad(state, ((0, bp - B), (0, 0)))  # zero rows, sliced off below

    inv2d = lambda a: pl.BlockSpec(a.shape, lambda i: (0, 0))  # grid-invariant block

    out_t = pl.pallas_call(
        _dqn_kernel,
        out_shape=jax.ShapeDtypeStruct((n_out, bp), jnp.float32),
        grid=(bp // tb,),
        in_specs=[
            pl.BlockSpec((tb, D), lambda i: (i, 0)),   # state: tiled over batch
            inv2d(w1), inv2d(b1),
            inv2d(w2), inv2d(b2),
            inv2d(w3), inv2d(b3t),
        ],
        out_specs=pl.BlockSpec((n_out, tb), lambda i: (0, i)),  # batch on lane axis
        compiler_params=pltpu.CompilerParams(
            dimension_semantics=("parallel",),
        ),
    )(state, w1, b1, w2, b2, w3, b3t)

    # [n_out, B] -> [B, n_out]; tiny, fuses under jit, touches only real outputs.
    return out_t[:, :B].T


def init_params(key, input_dim, fc1_dims, fc2_dims, n_outputs):
    """nn.Linear-style U(-1/sqrt(fan_in), 1/sqrt(fan_in)) init.
    w1/w2 stored [in, out]; w3 kept in PyTorch [out, in] layout and b3 as
    [n_outputs, 1] to match the kernel's transposed fc3 output (done once,
    outside the hot path)."""
    ks = jax.random.split(key, 6)

    def linear(kw, kb, fan_in, fan_out):
        bound = 1.0 / jnp.sqrt(jnp.float32(fan_in))
        w = jax.random.uniform(kw, (fan_in, fan_out), jnp.float32, -bound, bound)
        b = jax.random.uniform(kb, (1, fan_out), jnp.float32, -bound, bound)
        return w, b

    w1, b1 = linear(ks[0], ks[1], input_dim, fc1_dims)
    w2, b2 = linear(ks[2], ks[3], fc1_dims, fc2_dims)
    w3, b3 = linear(ks[4], ks[5], fc2_dims, n_outputs)
    return w1, b1, w2, b2, w3.T, b3.T   # fc3 params in transposed layout


if __name__ == "__main__":
    # TODO(synk): Adam optimizer / MSELoss / device placement are training infra,
    # not part of forward(), and are intentionally not translated.
    batch = 8
    input_dim = 32      # input_dims = (32,)
    fc1_dims = 64
    fc2_dims = 64
    n_outputs = 8

    key = jax.random.PRNGKey(0)
    k_x, k_p = jax.random.split(key)
    state = jax.random.normal(k_x, (batch, input_dim), jnp.float32)
    params = init_params(k_p, input_dim, fc1_dims, fc2_dims, n_outputs)

    actions = dqn_forward(state, *params)
    actions = jax.block_until_ready(actions)

    # Pure-JAX reference of the same forward pass (w3/b3 are in transposed layout).
    w1, b1, w2, b2, w3, b3t = params
    ref = jnp.maximum(state @ w1 + b1, 0.0)
    ref = jnp.maximum(ref @ w2 + b2, 0.0)
    ref = ref @ w3.T + b3t.T
    assert actions.shape == (batch, n_outputs)
    assert jnp.allclose(actions, ref, atol=1e-4, rtol=1e-4)

    print("KERNEL_OK")
</pallas_src>

<mosaic_0001>
module attributes {stable_mosaic.version = 11 : i64} {
  func.func @_dqn_kernel(%arg0: i32, %arg1: memref<8x32xf32, #tpu.memory_space<vmem>>, %arg2: memref<32x64xf32, #tpu.memory_space<vmem>>, %arg3: memref<1x64xf32, #tpu.memory_space<vmem>>, %arg4: memref<64x64xf32, #tpu.memory_space<vmem>>, %arg5: memref<1x64xf32, #tpu.memory_space<vmem>>, %arg6: memref<8x64xf32, #tpu.memory_space<vmem>>, %arg7: memref<8x1xf32, #tpu.memory_space<vmem>>, %arg8: memref<8x8xf32, #tpu.memory_space<vmem>>) attributes {dimension_semantics = [#tpu.dimension_semantics<parallel>], iteration_bounds = array<i64: 1>, scalar_prefetch = 0 : i64, scratch_operands = 0 : i64, tpu.core_type = #tpu.core_type<tc>, window_params = [{transform_indices = @transform_0, window_bounds = array<i64: 8, 32>}, {pipeline_mode = #tpu.pipeline_mode<synchronous>, transform_indices = @transform_1, window_bounds = array<i64: 32, 64>}, {pipeline_mode = #tpu.pipeline_mode<synchronous>, transform_indices = @transform_2, window_bounds = array<i64: 1, 64>}, {pipeline_mode = #tpu.pipeline_mode<synchronous>, transform_indices = @transform_3, window_bounds = array<i64: 64, 64>}, {pipeline_mode = #tpu.pipeline_mode<synchronous>, transform_indices = @transform_4, window_bounds = array<i64: 1, 64>}, {pipeline_mode = #tpu.pipeline_mode<synchronous>, transform_indices = @transform_5, window_bounds = array<i64: 8, 64>}, {pipeline_mode = #tpu.pipeline_mode<synchronous>, transform_indices = @transform_6, window_bounds = array<i64: 8, 1>}, {transform_indices = @transform_7, window_bounds = array<i64: 8, 8>}]} {
    %c0 = arith.constant 0 : index
    %c0_0 = arith.constant 0 : index
    %0 = vector.load %arg1[%c0, %c0_0] : memref<8x32xf32, #tpu.memory_space<vmem>>, vector<8x32xf32>
    %c0_1 = arith.constant 0 : index
    %c0_2 = arith.constant 0 : index
    %1 = vector.load %arg2[%c0_1, %c0_2] : memref<32x64xf32, #tpu.memory_space<vmem>>, vector<32x64xf32>
    %cst = arith.constant dense<0.000000e+00> : vector<8x64xf32>
    %2 = tpu.matmul %0, %1, %cst {dimension_numbers = #tpu.dot_dimension_numbers<[1], [0], [0], [1], [0, 0, 1, 1], [], []>} : vector<8x32xf32>, vector<32x64xf32>, vector<8x64xf32> -> vector<8x64xf32>
    %c0_3 = arith.constant 0 : index
    %c0_4 = arith.constant 0 : index
    %3 = vector.load %arg3[%c0_3, %c0_4] : memref<1x64xf32, #tpu.memory_space<vmem>>, vector<1x64xf32>
    %4 = vector.broadcast %3 : vector<1x64xf32> to vector<8x64xf32>
    %5 = arith.addf %2, %4 : vector<8x64xf32>
    %cst_5 = arith.constant 0.000000e+00 : f32
    %6 = vector.broadcast %cst_5 : f32 to vector<8x64xf32>
    %7 = arith.maximumf %5, %6 : vector<8x64xf32>
    %c0_6 = arith.constant 0 : index
    %c0_7 = arith.constant 0 : index
    %8 = vector.load %arg4[%c0_6, %c0_7] : memref<64x64xf32, #tpu.memory_space<vmem>>, vector<64x64xf32>
    %cst_8 = arith.constant dense<0.000000e+00> : vector<8x64xf32>
    %9 = tpu.matmul %7, %8, %cst_8 {dimension_numbers = #tpu.dot_dimension_numbers<[1], [0], [0], [1], [0, 0, 1, 1], [], []>} : vector<8x64xf32>, vector<64x64xf32>, vector<8x64xf32> -> vector<8x64xf32>
    %c0_9 = arith.constant 0 : index
    %c0_10 = arith.constant 0 : index
    %10 = vector.load %arg5[%c0_9, %c0_10] : memref<1x64xf32, #tpu.memory_space<vmem>>, vector<1x64xf32>
    %11 = vector.broadcast %10 : vector<1x64xf32> to vector<8x64xf32>
    %12 = arith.addf %9, %11 : vector<8x64xf32>
    %cst_11 = arith.constant 0.000000e+00 : f32
    %13 = vector.broadcast %cst_11 : f32 to vector<8x64xf32>
    %14 = arith.maximumf %12, %13 : vector<8x64xf32>
    %c0_12 = arith.constant 0 : index
    %c0_13 = arith.constant 0 : index
    %15 = vector.load %arg6[%c0_12, %c0_13] : memref<8x64xf32, #tpu.memory_space<vmem>>, vector<8x64xf32>
    %cst_14 = arith.constant dense<0.000000e+00> : vector<8x8xf32>
    %16 = tpu.matmul %15, %14, %cst_14 {dimension_numbers = #tpu.dot_dimension_numbers<[1], [1], [0], [0], [0, 0, 1, 0], [], []>} : vector<8x64xf32>, vector<8x64xf32>, vector<8x8xf32> -> vector<8x8xf32>
    %c0_15 = arith.constant 0 : index
    %c0_16 = arith.constant 0 : index
    %17 = vector.load %arg7[%c0_15, %c0_16] : memref<8x1xf32, #tpu.memory_space<vmem>>, vector<8x1xf32>
    %18 = vector.broadcast %17 : vector<8x1xf32> to vector<8x8xf32>
    %19 = arith.addf %16, %18 : vector<8x8xf32>
    %c0_17 = arith.constant 0 : index
    %c0_18 = arith.constant 0 : index
    %20 = vector.load %arg8[%c0_17, %c0_18] : memref<8x8xf32, #tpu.memory_space<vmem>>, vector<8x8xf32>
    tpu.vector_store %arg8[%c0_17, %c0_18], %19 {strides = array<i32>} : memref<8x8xf32, #tpu.memory_space<vmem>>, vector<8x8xf32>,
    return
  }
  func.func @transform_0(%arg0: i32) -> (i32, i32) {
    %c0_i32 = arith.constant 0 : i32
    %c0_i32_0 = arith.constant 0 : i32
    return %arg0, %c0_i32 : i32, i32
  }
  func.func @transform_1(%arg0: i32) -> (i32, i32) {
    %c0_i32 = arith.constant 0 : i32
    %c0_i32_0 = arith.constant 0 : i32
    %c0_i32_1 = arith.constant 0 : i32
    return %c0_i32, %c0_i32_0 : i32, i32
  }
  func.func @transform_2(%arg0: i32) -> (i32, i32) {
    %c0_i32 = arith.constant 0 : i32
    %c0_i32_0 = arith.constant 0 : i32
    %c0_i32_1 = arith.constant 0 : i32
    return %c0_i32, %c0_i32_0 : i32, i32
  }
  func.func @transform_3(%arg0: i32) -> (i32, i32) {
    %c0_i32 = arith.constant 0 : i32
    %c0_i32_0 = arith.constant 0 : i32
    %c0_i32_1 = arith.constant 0 : i32
    return %c0_i32, %c0_i32_0 : i32, i32
  }
  func.func @transform_4(%arg0: i32) -> (i32, i32) {
    %c0_i32 = arith.constant 0 : i32
    %c0_i32_0 = arith.constant 0 : i32
    %c0_i32_1 = arith.constant 0 : i32
    return %c0_i32, %c0_i32_0 : i32, i32
  }
  func.func @transform_5(%arg0: i32) -> (i32, i32) {
    %c0_i32 = arith.constant 0 : i32
    %c0_i32_0 = arith.constant 0 : i32
    %c0_i32_1 = arith.constant 0 : i32
    return %c0_i32, %c0_i32_0 : i32, i32
  }
  func.func @transform_6(%arg0: i32) -> (i32, i32) {
    %c0_i32 = arith.constant 0 : i32
    %c0_i32_0 = arith.constant 0 : i32
    %c0_i32_1 = arith.constant 0 : i32
    return %c0_i32, %c0_i32_0 : i32, i32
  }
  func.func @transform_7(%arg0: i32) -> (i32, i32) {
    %c0_i32 = arith.constant 0 : i32
    %c0_i32_0 = arith.constant 0 : i32
    return %c0_i32, %arg0 : i32, i32
  }
}

</mosaic_0001>

<bundles_post_ra>
// kernel: dqn_forward.1
= control target key start
LH: loop header
LB: loop body
LE: loop exit
PB: predicated region body
PF: predicated region fallthrough
CT: control target
= control target key end

     0   :  { %12 = vsyncpa [#allocation3], 0  ;;  %s598_s0 = inlined_call_operand.vmem [shape: f32[8,32], index: 0, kind: input, shape index: {}]   ;;  %s599_s1 = inlined_call_operand.hbm [shape: f32[32,64], index: 1, kind: input, shape index: {}]   ;;  %s600_s2 = inlined_call_operand.hbm [shape: f32[1,64], index: 2, kind: input, shape index: {}]   ;;  %s601_s3 = inlined_call_operand.hbm [shape: f32[64,64], index: 3, kind: input, shape index: {}]   ;;  %s602_s4 = inlined_call_operand.vmem [shape: f32[1,64], index: 4, kind: input, shape index: {}]   ;;  %s603_s5 = inlined_call_operand.vmem [shape: f32[8,64], index: 5, kind: input, shape index: {}]   ;;  %s604_s6 = inlined_call_operand.vmem [shape: f32[8,1], index: 6, kind: input, shape index: {}]   ;;  %s605_s7 = inlined_call_operand.vmem [shape: f32[8,8], index: 7, kind: output, shape index: {}]  }
   0x1   :  { %13 = vsyncpa [#allocation5], 0  ;;  %s488_s24 = smov [#allocation4]   ;;  %s489_s26 = smov [#allocation2]  }
   0x2   :  { %s34_s25 = sshll.u32 %s488_s24, 4  ;;  %s21_s27 = sshll.u32 %s489_s26, 4  ;;  %s35_s25 = int_to_ptr.vmem [resolvable:$true] %s34_s25  ;;  %s537_s27 = int_to_ptr.vmem [resolvable:$true] %s21_s27 }
   0x3   :  { %s418_s30 = scalar_lea.hbm %s600_s2, 16 }
   0x4   :  { %p419_p0 = scmp.ne.s32.totalorder %s600_s2, %s418_s30  ;;  %p422_p1 = scmp.lt.u32.totalorder %s418_s30, %s600_s2 }
   0x6   :  { %p424_p2 = pnand %p422_p1, %p419_p0 }
   0x8   :  { %427 = shalt.err (!%p424_p2)
}
   0x9   :  { %s428_s12 = scalar_lea.vmem %s35_s25, 16  ;;  %s432_s13 = scalar_lea.vmem %s35_s25, 32 }
   0xa   :  { %p429_p3 = scmp.ne.s32.totalorder %s35_s25, %s428_s12  ;;  %p433_p4 = scmp.lt.s32.totalorder %s35_s25, %s35_s25 }
   0xb   :  { %p434_p5 = scmp.lt.s32.totalorder %s432_s13, %s428_s12 }
   0xd   :  { %p435_p6 = por %p434_p5, %p433_p4 }
   0xf   :  { %p436_p7 = pnand %p435_p6, %p429_p3 }
  0x11   :  { %439 = shalt.err (!%p436_p7)
}
  0x12   :  { %37 = dma.hbm_to_vmem [thread:$0]  %s600_s2, 16, %s35_s25, [#allocation5]  }
  0x13   :  { %s440_s18 = scalar_lea.hbm %s599_s1, 512 }
  0x14   :  { %p441_p8 = scmp.ne.s32.totalorder %s599_s1, %s440_s18  ;;  %p444_p9 = scmp.lt.u32.totalorder %s440_s18, %s599_s1 }
  0x16   :  { %p446_p10 = pnand %p444_p9, %p441_p8 }
  0x18   :  { %449 = shalt.err (!%p446_p10)
}
  0x19   :  { %s450_s23 = scalar_lea.vmem %s537_s27, 512  ;;  %p455_p12 = scmp.lt.s32.totalorder %s537_s27, %s537_s27 }
  0x1a   :  { %p451_p11 = scmp.ne.s32.totalorder %s537_s27, %s450_s23  ;;  %p456_p13 = scmp.lt.s32.totalorder %s450_s23, %s450_s23 }
  0x1c   :  { %p457_p0 = por %p456_p13, %p455_p12 }
  0x1e   :  { %p458_p1 = pnand %p457_p0, %p451_p11 }
  0x20   :  { %461 = shalt.err (!%p458_p1)
}
  0x21   :  { %s490_s2 = smov 128   ;;  %s491_s24 = smov 8  }
  0x22   :  { %27 = dma.hbm_to_vmem [thread:$0]  %s599_s1, 512, %s537_s27, [#allocation3], %s490_s2, %s490_s2, %s491_s24  }
  0x23   :  { %s492_s28 = smov [#allocation6]   ;;  %s462_s9 = scalar_lea.hbm %s601_s3, 1024 }
  0x24   :  { %s43_s29 = sshll.u32 %s492_s28, 4  ;;  %p463_p2 = scmp.ne.s32.totalorder %s601_s3, %s462_s9  ;;  %s44_s29 = int_to_ptr.vmem [resolvable:$true] %s43_s29 }
  0x25   :  { %p466_p3 = scmp.lt.u32.totalorder %s462_s9, %s601_s3 }
  0x27   :  { %p468_p4 = pnand %p466_p3, %p463_p2 }
  0x29   :  { %471 = shalt.err (!%p468_p4)
}
  0x2a   :  { %s472_s14 = scalar_lea.vmem %s44_s29, 1024  ;;  %p477_p6 = scmp.lt.s32.totalorder %s44_s29, %s44_s29 }
  0x2b   :  { %p473_p5 = scmp.ne.s32.totalorder %s44_s29, %s472_s14  ;;  %p478_p7 = scmp.lt.s32.totalorder %s472_s14, %s472_s14 }
  0x2d   :  { %p479_p8 = por %p478_p7, %p477_p6 }
  0x2f   :  { %p480_p9 = pnand %p479_p8, %p473_p5 }
  0x31   :  { %483 = shalt.err (!%p480_p9)
}
  0x32   :  { %49 = dma.hbm_to_vmem [thread:$0]  %s601_s3, 1024, %s44_s29, [#allocation5], %s490_s2, %s490_s2, %s491_s24  }
  0x33   :  { %484 = dma.done.wait [#allocation3], 512  }
  0x34   :  { %485 = vsyncadd [#allocation3], 4294966784 }
  0x35   :  { %486 = dma.done.wait [#allocation5], 1040  }
  0x36   :  { %487 = vsyncadd [#allocation5], 4294966256  ;;  %v493_v0 = vmov 0.0|0.0   ;;  %vm494_vm0 = vmmov 0   ;;  %v495_v1 = vmov 0.0   ;;  %v66_v2 = vld [vmem:[#allocation2] sm:$0xff] }
  0x37   :  { %390 = vmatprep.subr.bf16.mxu0 %v493_v0  ;;  %363 = vmatprep.mubr.msk.f32.mxu0 %vm494_vm0, %v495_v1  ;;  %v67_v3 = vld [vmem:[#allocation2 + $0x8] sm:$0xff]  ;;  %v68_v4 = vld [vmem:[#allocation2 + $0x10] sm:$0xff]  ;;  %v69_v6 = vld [vmem:[#allocation2 + $0x18] sm:$0xff]  ;;  %vm77_vm1 = vcmask 261120   ;;  %vm167_vm2 = vcmask 523264   ;;  %v496_v27 = vmov 0  }
  0x38   :  { %396 = vmatprep.subr.bf16.mxu1 %v493_v0  ;;  %382 = vmatprep.mubr.msk.f32.mxu1 %vm494_vm0, %v495_v1  ;;  %v391_v5 = vpack.c.bf16 %v67_v3, %v66_v2  ;;  %v152_v7 = vld [vmem:[#allocation6] sm:$0xff]  ;;  %v153_v8 = vld [vmem:[#allocation6 + $0x8] sm:$0xff]  ;;  %v154_v9 = vld [vmem:[#allocation6 + $0x10] sm:$0xff]  ;;  %v394_v11 = vpack.c.bf16 %v69_v6, %v68_v4  ;;  %vm325_vm3 = vcmask 64512  }
  0x39   :  { %v155_v10 = vld [vmem:[#allocation6 + $0x18] sm:$0xff]  ;;  %v397_v12 = vpack.c.bf16 %v153_v8, %v152_v7  ;;  %v156_v14 = vld [vmem:[#allocation6 + $0x20] sm:$0xff]  ;;  %v157_v15 = vld [vmem:[#allocation6 + $0x28] sm:$0xff]  ;;  %417 = vset.pattern.permute.xlu0 %v496_v27 }
  0x3a   :  { %392 = vmatpush3.bf16.msra.mxu0 %v391_v5  ;;  %v400_v13 = vpack.c.bf16 %v155_v10, %v154_v9  ;;  %v65_v16 = vld [vmem:[%s598_s0] sm:$0xff]  ;;  %v403_v17 = vpack.c.bf16 %v157_v15, %v156_v14  ;;  %v158_v18 = vld [vmem:[#allocation6 + $0x30] sm:$0xff] }
  0x3b   :  { %393 = vmatprep.subr.bf16.mxu0 %v493_v0  ;;  %398 = vmatpush3.bf16.msra.mxu1 %v397_v12  ;;  %v159_v19 = vld [vmem:[#allocation6 + $0x38] sm:$0xff] }
  0x3c   :  { %399 = vmatprep.subr.bf16.mxu1 %v493_v0  ;;  %v406_v20 = vpack.c.bf16 %v159_v19, %v158_v18  ;;  %v333_v21 = vld [vmem:[#allocation4] ss:$0 sm:$0xff] }
  0x3d   :  { %v243_v26 = vld [vmem:[%s604_s6] sm:$0xff] }
  0x3e   :  { %395 = vmatpush3.bf16.msra.mxu0 %v394_v11  ;;  %246 = vperm.xlu0 %417, %v243_v26   ;;  %v335_v28 = vld [vmem:[%s602_s4] ss:$0 sm:$0xff] }
  0x3f   :  { %385 = vmatprep.subr.mxu0 %v495_v1  ;;  %401 = vmatpush3.bf16.msra.mxu1 %v400_v13  ;;  %v242_v33 = vld [vmem:[%s603_s5] sm:$0xff] }
  0x40   :  { %402 = vmatprep.subr.bf16.mxu1 %v493_v0 }
  0x41   :  { %364 = vmatmul.mubr.msk.f32.vlgmr.msra.gmra.mrb[0].mxu0 %vm77_vm1, %v65_v16 }
  0x42   :  { %387 = vmatprep.mubr.msk.f32.mxu0 %vm494_vm0, %v495_v1 }
  0x43   :  { %404 = vmatpush3.bf16.msra.mxu1 %v403_v17 }
  0x44   :  { %405 = vmatprep.subr.bf16.mxu1 %v493_v0 }
  0x47   :  { %407 = vmatpush3.bf16.msra.mxu1 %v406_v20 }
  0xbd   :  { %v247_v34 = vpop.permute.xlu0 %246 }
 0x114   :  { %v147_v22 = vpop.f32.mrb[0].mxu0 }
 0x115   :  { %v148_v23 = vadd.f32 %v333_v21, %v147_v22  ;;  %v365_v24 = vpop.f32.mrb[1].mxu0 }
 0x117   :  { %v151_v25 = vmax.f32 %v148_v23, 0.0 }
 0x119   :  { %383 = vmatmul.mubr.msk.f32.vlgmr.msra.gmra.mrb[0].mxu1 %vm167_vm2, %v151_v25 }
 0x1ec   :  { %v237_v29 = vpop.f32.mrb[0].mxu1 }
 0x1ed   :  { %v238_v30 = vadd.f32 %v335_v28, %v237_v29  ;;  %v384_v31 = vpop.f32.mrb[1].mxu1 }
 0x1ef   :  { %v241_v32 = vmax.f32 %v238_v30, 0.0 }
 0x1f1   :  { %386 = vmatpush3.xpose.msk.msra.mxu0 %vm167_vm2, %v241_v32 }
 0x1f4   :  { %388 = vmatmul.mubr.msk.f32.vlgmr.msra.gmra.mrb[2].mxu0 %vm167_vm2, %v242_v33 }
 0x2c7   :  { %v321_v35 = vpop.f32.mrb[2].mxu0 }
 0x2c8   :  { %v322_v36 = vadd.f32 %v321_v35, %v247_v34  ;;  %v389_v37 = vpop.f32.mrb[3].mxu0 }
 0x2ca   :  { %326 = vst.msk [vmem:[%s605_s7] sm:$0xff] %vm325_vm3, %v322_v36 }
 0x2cb   :  { %331 = vsyncpa [#allocation3], 1 }
 0x2cc   :  { %332 = vsyncpa [#allocation5], 1 }

</bundles_post_ra>
